<compile_context>
chip_gen: v5e
topology: v5e:2x2
jax: 0.10.0
libtpu: 0.0.40
codegen_flags: <defaults>
</compile_context>

<pallas_src>
import functools

import jax
import jax.numpy as jnp
from jax.experimental import pallas as pl
from jax.experimental.pallas import tpu as pltpu


def calc_padding_1d(n_timesteps, kernel_size, stride=1):
    # mirrors pytorch_utils.calc_padding_1d (does NOT account for dilation)
    padding = (stride * (n_timesteps - 1) + kernel_size - n_timesteps) / 2.0
    return int(padding)


def _dwconv1d_kernel(x_ref, wb_ref, o_ref, *scratch, kernel_size, dilation,
                     padding, t, t_out, hw):
    # x_ref  : (NB, RC, T*HW)      block of batch x channel rows, time-major flattened lanes
    # wb_ref : (RC, K+1)           per-channel taps (cols 0..K-1) and bias (col K)
    # o_ref  : (NB, RC, T_out*HW)
    # scratch: optional f32 accumulator (only allocated when o dtype != f32)
    acc_ref = scratch[0] if scratch else o_ref          # f32 in both cases

    wb = wb_ref[...].astype(jnp.float32)                 # tiny; hoisted once
    bias = wb[None, :, kernel_size:kernel_size + 1]      # (1, RC, 1)
    acc_ref[...] = jnp.broadcast_to(bias, acc_ref.shape)

    # K is small & static: unrolled shift-and-accumulate on the VPU.  Tap k contributes
    # w[k] * x[to + k*d - p] to output time `to`; the valid `to` range is static, so the
    # zero-padding never needs to be materialized.
    for k in range(kernel_size):
        lo = max(0, padding - k * dilation)              # first valid output timestep
        hi = min(t_out, t + padding - k * dilation)      # one past the last valid
        if hi <= lo:
            continue
        xs = lo + k * dilation - padding                 # >= 0 by construction
        n_lanes = (hi - lo) * hw
        xk = x_ref[:, :, xs * hw: xs * hw + n_lanes].astype(jnp.float32)
        wk = wb[None, :, k:k + 1]                        # (1, RC, 1) lane-broadcast
        acc_ref[:, :, lo * hw: lo * hw + n_lanes] = (
            acc_ref[:, :, lo * hw: lo * hw + n_lanes] + xk * wk)

    if scratch:
        o_ref[...] = acc_ref[...].astype(o_ref.dtype)


def _vmem_config():
    """Generation-aware VMEM budget / limit and grid-step policy."""
    mib = 1024 * 1024
    try:
        cap = int(pltpu.get_tpu_info().vmem_capacity_bytes)
    except Exception:
        cap = 64 * mib                                   # conservative default (v7x-class)
    if cap <= 80 * mib:
        # v7x-class: 64 MiB per TensorCore -> keep >= 25% headroom, >= 4 balanced steps.
        budget = min(22 * mib, int(cap * 0.34))
        limit = min(44 * mib, int(cap * 0.70))
        min_steps, prefer_even = 4, True
    else:
        # v5e / v6e: 128 MiB physical VMEM -> big blocks, >= 2 steps is enough (single TC).
        budget = min(48 * mib, int(cap * 0.40))
        limit = min(96 * mib, int(cap * 0.75))
        min_steps, prefer_even = 2, False
    return budget, limit, min_steps, prefer_even


def _pick_tiles(n, c, per_row_bytes, budget_bytes, sublane_mult, min_steps, prefer_even):
    """Choose (nb, rc): batch rows and channel rows per block."""
    rows_fit = max(1, int(budget_bytes // max(per_row_bytes, 1)))
    if rows_fit >= c:
        rc = c                                           # full channel dim -> params resident
        nb = max(1, min(n, rows_fit // c))
        if n >= min_steps:
            nb = min(nb, -(-n // min_steps))             # keep >= min_steps grid steps
        if prefer_even and nb < n:
            steps = -(-n // nb)
            if steps > 1 and steps % 2 == 1:             # balance the two v7x TensorCores
                nb = max(1, -(-n // (steps + 1)))
    else:
        nb = 1
        rc = min(c, max(sublane_mult, (rows_fit // sublane_mult) * sublane_mult))
    return nb, rc


def depthwise_temporal_conv_pallas(x3, wb, t, t_out, kernel_size, dilation, padding, hw):
    # x3: (N, C, T*HW) contiguous view; wb: (C, K+1) f32 taps+bias.
    n, c, _ = x3.shape
    dtype = x3.dtype
    itemsize = jnp.dtype(dtype).itemsize
    budget, limit, min_steps, prefer_even = _vmem_config()
    sub = 8 * max(1, 4 // itemsize)       # sublane multiple: 8 f32, 16 bf16, 32 int8

    needs_acc = dtype != jnp.float32
    # Conservative per-(n,c)-row VMEM: double-buffered in/out blocks, optional f32
    # accumulator, ~3 full-row f32 temporaries in the tap chain, lane-padded weight slice.
    per_row = (itemsize * hw * (2 * t + 2 * t_out)
               + (4 * t_out * hw if needs_acc else 0)
               + 3 * 4 * hw * max(t, t_out)
               + 1024)
    nb, rc = _pick_tiles(n, c, per_row, budget, sub, min_steps, prefer_even)

    kp1 = kernel_size + 1
    kernel = functools.partial(
        _dwconv1d_kernel, kernel_size=kernel_size, dilation=dilation,
        padding=padding, t=t, t_out=t_out, hw=hw)

    scratch_shapes = []
    if needs_acc:
        scratch_shapes.append(pltpu.VMEM((nb, rc, t_out * hw), jnp.float32))

    return pl.pallas_call(
        kernel,
        out_shape=jax.ShapeDtypeStruct((n, c, t_out * hw), dtype),
        # Channel-block axis OUTER: the (rc, K+1) parameter block index is constant across
        # the inner batch axis, so its DMA is only re-issued when the channel block changes.
        grid=(pl.cdiv(c, rc), pl.cdiv(n, nb)),
        in_specs=[
            pl.BlockSpec((nb, rc, t * hw), lambda cb, nbk: (nbk, cb, 0)),
            pl.BlockSpec((rc, kp1), lambda cb, nbk: (cb, 0)),
        ],
        out_specs=pl.BlockSpec((nb, rc, t_out * hw), lambda cb, nbk: (nbk, cb, 0)),
        scratch_shapes=scratch_shapes,
        compiler_params=pltpu.CompilerParams(
            dimension_semantics=("parallel", "parallel"),
            vmem_limit_bytes=int(limit),
        ),
    )(x3, wb)


def temporal_conv1d_layer(x_ncthw, weight_c1k, bias_c, kernel_size, dilation):
    """Forward of TemporalConv1DLayer. x_ncthw: (N, C, T, H, W)."""
    n, c, t, h, w = x_ncthw.shape
    padding = calc_padding_1d(t, kernel_size)
    t_out = t + 2 * padding - dilation * (kernel_size - 1)
    assert t_out >= 1, "invalid (T, kernel_size, dilation) combination"
    hw = h * w

    # Free, contiguous view of the native NCTHW layout (no HBM transpose passes).
    x3 = x_ncthw.reshape(n, c, t * hw)
    # Per-channel taps + bias packed into one tiny (C, K+1) array (no per-batch tiling).
    wb = jnp.concatenate(
        [weight_c1k[:, 0, :].astype(jnp.float32),
         bias_c.reshape(c, 1).astype(jnp.float32)], axis=1)

    y3 = depthwise_temporal_conv_pallas(
        x3, wb, t, t_out, kernel_size, dilation, padding, hw)
    return y3.reshape(n, c, t_out, h, w)


if __name__ == "__main__":
    # Small shapes consistent with the module's (BN, C, T, H, W) input.
    N, C, T, H, W = 2, 8, 16, 4, 4
    kernel_size, dilation = 3, 1

    key = jax.random.PRNGKey(0)
    kx, kw, kb = jax.random.split(key, 3)

    x = jax.random.normal(kx, (N, C, T, H, W), dtype=jnp.float32)

    # Conv1d-shaped params: weight (C_out=C, C_in/groups=1, K), bias (C,)
    fan_in = 1 * kernel_size
    bound = float(1.0 / jnp.sqrt(jnp.float32(fan_in)))
    weight = jax.random.uniform(kw, (C, 1, kernel_size), jnp.float32, -bound, bound)
    bias = jax.random.uniform(kb, (C,), jnp.float32, -bound, bound)

    out = temporal_conv1d_layer(x, weight, bias, kernel_size, dilation)
    out = jax.block_until_ready(out)

    # Independent reference: the module's own recipe via lax grouped conv on the (B, C, T) view.
    padding = calc_padding_1d(T, kernel_size)
    x_bct = jnp.transpose(x, (0, 3, 4, 1, 2)).reshape(N * H * W, C, T)
    ref = jax.lax.conv_general_dilated(
        x_bct, weight,
        window_strides=(1,), padding=[(padding, padding)],
        rhs_dilation=(dilation,),
        dimension_numbers=("NCH", "OIH", "NCH"),
        feature_group_count=C,
    ) + bias[None, :, None]
    t_out = ref.shape[-1]
    ref = jnp.transpose(ref.reshape(N, H, W, C, t_out), (0, 3, 4, 1, 2))

    assert out.shape == (N, C, t_out, H, W), out.shape
    assert jnp.allclose(out, ref, atol=1e-5, rtol=1e-5), float(jnp.max(jnp.abs(out - ref)))

    print("KERNEL_OK")
</pallas_src>

<mosaic_0001>
module attributes {stable_mosaic.version = 11 : i64} {
  func.func @_dwconv1d_kernel(%arg0: i32, %arg1: i32, %arg2: memref<2x8x256xf32, #tpu.memory_space<vmem>>, %arg3: memref<8x4xf32, #tpu.memory_space<vmem>>, %arg4: memref<2x8x256xf32, #tpu.memory_space<vmem>>) attributes {dimension_semantics = [#tpu.dimension_semantics<parallel>, #tpu.dimension_semantics<parallel>], iteration_bounds = array<i64: 1, 1>, scalar_prefetch = 0 : i64, scratch_operands = 0 : i64, tpu.core_type = #tpu.core_type<tc>, window_params = [{transform_indices = @transform_0, window_bounds = array<i64: 2, 8, 256>}, {transform_indices = @transform_1, window_bounds = array<i64: 8, 4>}, {transform_indices = @transform_2, window_bounds = array<i64: 2, 8, 256>}]} {
    %c0 = arith.constant 0 : index
    %c0_0 = arith.constant 0 : index
    %0 = vector.load %arg3[%c0, %c0_0] : memref<8x4xf32, #tpu.memory_space<vmem>>, vector<8x4xf32>
    %1 = vector.extract_strided_slice %0 {offsets = [0, 3], sizes = [8, 1], strides = [1, 1]} : vector<8x4xf32> to vector<8x1xf32>
    %2 = vector.shape_cast %1 : vector<8x1xf32> to vector<1x8x1xf32>
    %3 = vector.shape_cast %2 : vector<1x8x1xf32> to vector<1x8x1xf32>
    %4 = vector.broadcast %3 : vector<1x8x1xf32> to vector<2x8x256xf32>
    %c0_1 = arith.constant 0 : index
    %c0_2 = arith.constant 0 : index
    %c0_3 = arith.constant 0 : index
    %5 = vector.load %arg4[%c0_1, %c0_2, %c0_3] : memref<2x8x256xf32, #tpu.memory_space<vmem>>, vector<2x8x256xf32>
    tpu.vector_store %arg4[%c0_1, %c0_2, %c0_3], %4 {strides = array<i32>} : memref<2x8x256xf32, #tpu.memory_space<vmem>>, vector<2x8x256xf32>,
    %c0_4 = arith.constant 0 : index
    %c0_5 = arith.constant 0 : index
    %c0_6 = arith.constant 0 : index
    %6 = vector.load %arg2[%c0_4, %c0_5, %c0_6] : memref<2x8x256xf32, #tpu.memory_space<vmem>>, vector<2x8x240xf32>
    %7 = vector.extract_strided_slice %0 {offsets = [0, 0], sizes = [8, 1], strides = [1, 1]} : vector<8x4xf32> to vector<8x1xf32>
    %8 = vector.shape_cast %7 : vector<8x1xf32> to vector<1x8x1xf32>
    %c0_7 = arith.constant 0 : index
    %c0_8 = arith.constant 0 : index
    %c16 = arith.constant 16 : index
    %9 = vector.load %arg4[%c0_7, %c0_8, %c16] : memref<2x8x256xf32, #tpu.memory_space<vmem>>, vector<2x8x240xf32>
    %10 = vector.broadcast %8 : vector<1x8x1xf32> to vector<2x8x240xf32>
    %11 = arith.mulf %6, %10 : vector<2x8x240xf32>
    %12 = arith.addf %9, %11 : vector<2x8x240xf32>
    %c0_9 = arith.constant 0 : index
    %c0_10 = arith.constant 0 : index
    %c16_11 = arith.constant 16 : index
    %13 = vector.load %arg4[%c0_9, %c0_10, %c16_11] : memref<2x8x256xf32, #tpu.memory_space<vmem>>, vector<2x8x240xf32>
    tpu.vector_store %arg4[%c0_9, %c0_10, %c16_11], %12 {strides = array<i32>} : memref<2x8x256xf32, #tpu.memory_space<vmem>>, vector<2x8x240xf32>,
    %c0_12 = arith.constant 0 : index
    %c0_13 = arith.constant 0 : index
    %c0_14 = arith.constant 0 : index
    %14 = vector.load %arg2[%c0_12, %c0_13, %c0_14] : memref<2x8x256xf32, #tpu.memory_space<vmem>>, vector<2x8x256xf32>
    %15 = vector.extract_strided_slice %0 {offsets = [0, 1], sizes = [8, 1], strides = [1, 1]} : vector<8x4xf32> to vector<8x1xf32>
    %16 = vector.shape_cast %15 : vector<8x1xf32> to vector<1x8x1xf32>
    %c0_15 = arith.constant 0 : index
    %c0_16 = arith.constant 0 : index
    %c0_17 = arith.constant 0 : index
    %17 = vector.load %arg4[%c0_15, %c0_16, %c0_17] : memref<2x8x256xf32, #tpu.memory_space<vmem>>, vector<2x8x256xf32>
    %18 = vector.broadcast %16 : vector<1x8x1xf32> to vector<2x8x256xf32>
    %19 = arith.mulf %14, %18 : vector<2x8x256xf32>
    %20 = arith.addf %17, %19 : vector<2x8x256xf32>
    %c0_18 = arith.constant 0 : index
    %c0_19 = arith.constant 0 : index
    %c0_20 = arith.constant 0 : index
    %21 = vector.load %arg4[%c0_18, %c0_19, %c0_20] : memref<2x8x256xf32, #tpu.memory_space<vmem>>, vector<2x8x256xf32>
    tpu.vector_store %arg4[%c0_18, %c0_19, %c0_20], %20 {strides = array<i32>} : memref<2x8x256xf32, #tpu.memory_space<vmem>>, vector<2x8x256xf32>,
    %c0_21 = arith.constant 0 : index
    %c0_22 = arith.constant 0 : index
    %c16_23 = arith.constant 16 : index
    %22 = vector.load %arg2[%c0_21, %c0_22, %c16_23] : memref<2x8x256xf32, #tpu.memory_space<vmem>>, vector<2x8x240xf32>
    %23 = vector.extract_strided_slice %0 {offsets = [0, 2], sizes = [8, 1], strides = [1, 1]} : vector<8x4xf32> to vector<8x1xf32>
    %24 = vector.shape_cast %23 : vector<8x1xf32> to vector<1x8x1xf32>
    %c0_24 = arith.constant 0 : index
    %c0_25 = arith.constant 0 : index
    %c0_26 = arith.constant 0 : index
    %25 = vector.load %arg4[%c0_24, %c0_25, %c0_26] : memref<2x8x256xf32, #tpu.memory_space<vmem>>, vector<2x8x240xf32>
    %26 = vector.broadcast %24 : vector<1x8x1xf32> to vector<2x8x240xf32>
    %27 = arith.mulf %22, %26 : vector<2x8x240xf32>
    %28 = arith.addf %25, %27 : vector<2x8x240xf32>
    %c0_27 = arith.constant 0 : index
    %c0_28 = arith.constant 0 : index
    %c0_29 = arith.constant 0 : index
    %29 = vector.load %arg4[%c0_27, %c0_28, %c0_29] : memref<2x8x256xf32, #tpu.memory_space<vmem>>, vector<2x8x240xf32>
    tpu.vector_store %arg4[%c0_27, %c0_28, %c0_29], %28 {strides = array<i32>} : memref<2x8x256xf32, #tpu.memory_space<vmem>>, vector<2x8x240xf32>,
    return
  }
  func.func @transform_0(%arg0: i32, %arg1: i32) -> (i32, i32, i32) {
    %c0_i32 = arith.constant 0 : i32
    %c0_i32_0 = arith.constant 0 : i32
    return %arg1, %arg0, %c0_i32 : i32, i32, i32
  }
  func.func @transform_1(%arg0: i32, %arg1: i32) -> (i32, i32) {
    %c0_i32 = arith.constant 0 : i32
    %c0_i32_0 = arith.constant 0 : i32
    return %arg0, %c0_i32 : i32, i32
  }
  func.func @transform_2(%arg0: i32, %arg1: i32) -> (i32, i32, i32) {
    %c0_i32 = arith.constant 0 : i32
    %c0_i32_0 = arith.constant 0 : i32
    return %arg1, %arg0, %c0_i32 : i32, i32, i32
  }
}

</mosaic_0001>

<bundles_post_ra>
// kernel: tpu_custom_call.1
= control target key start
LH: loop header
LB: loop body
LE: loop exit
PB: predicated region body
PF: predicated region fallthrough
CT: control target
= control target key end

     0   :  { %7 = vsyncpa [#allocation3], 0  ;;  %s280_s0 = inlined_call_operand.hbm [shape: f32[2,8,256], index: 0, kind: input, shape index: {}]   ;;  %s281_s1 = inlined_call_operand.vmem [shape: f32[8,4], index: 1, kind: input, shape index: {}]   ;;  %s282_s2 = inlined_call_operand.hbm [shape: f32[2,8,256], index: 2, kind: output, shape index: {}]  }
   0x1   :  { %8 = vsyncpa [#allocation4], 0  ;;  %s13_s11 = sshll.u32 %s280_s0, 4  ;;  %s233_s12 = smov [#allocation2]   ;;  %s14_s11 = int_to_ptr.hbm [resolvable:$true] %s13_s11 }
   0x2   :  { %s15_s13 = sshll.u32 %s233_s12, 4  ;;  %s234_s14 = smov 256   ;;  %s16_s13 = int_to_ptr.vmem [resolvable:$true] %s15_s13 }
   0x3   :  { %s235_s15 = smov 16  }
   0x4   :  { %21 = dma.hbm_to_vmem [thread:$0]  %s14_s11, 512, %s16_s13, [#allocation3], %s234_s14, %s234_s14, %s235_s15  }
   0x5   :  { %229 = dma.done.wait [#allocation3], 512  }
   0x6   :  { %230 = vsyncadd [#allocation3], 4294966784  ;;  %v236_v0 = vmov 0   ;;  %v237_v1 = vmov 3   ;;  %v28_v2 = vld [vmem:[%s281_s1] sm:$0xff]  ;;  %v238_v3 = vmov 2  }
   0x7   :  { %177 = vset.pattern.permute.xlu0 %v236_v0  ;;  %179 = vset.pattern.permute.xlu1 %v237_v1  ;;  %v239_v4 = vmov 1   ;;  %v39_v5 = vld [vmem:[#allocation2 + $0x8] sm:$0xff]  ;;  %v38_v6 = vld [vmem:[#allocation2] sm:$0xff]  ;;  %v40_v11 = vld [vmem:[#allocation2 + $0x10] sm:$0xff]  ;;  %s240_s0 = smov 112   ;;  %vm77_vm0 = vcmask 1047680  }
   0x8   :  { %47 = vperm.xlu0 %177, %v28_v2   ;;  %31 = vperm.xlu1 %179, %v28_v2   ;;  %v41_v12 = vld [vmem:[#allocation2 + $0x18] sm:$0xff]  ;;  %vm66_vm1 = vcmask 130048   ;;  %vm134_vm2 = vcmask 916480   ;;  %s241_s1 = smov [#allocation5]   ;;  %s155_s21 = sshll.u32 %s282_s2, 4  ;;  %s156_s21 = int_to_ptr.hbm [resolvable:$true] %s155_s21 }
   0x9   :  { %180 = vset.pattern.permute.xlu2 %v239_v4  ;;  %s153_s18 = sshll.u32 %s241_s1, 4  ;;  %s154_s18 = int_to_ptr.vmem [resolvable:$true] %s153_s18 }
  0x10   :  { %178 = vset.pattern.permute.xlu0 %v238_v3 }
  0x11   :  { %115 = vperm.xlu0 %178, %v28_v2  }
  0x7a   :  { %v48_v7 = vpop.permute.xlu0 %47  ;;  %v32_v8 = vpop.permute.xlu1 %31 }
  0x7b   :  { %v51_v9 = vmul.f32 %v48_v7, %v39_v5  ;;  %v50_v10 = vmul.f32 %v48_v7, %v38_v6  ;;  %34 = vst [vmem:[#allocation5] sm:$0xff] %v32_v8  ;;  %v52_v14 = vmul.f32 %v48_v7, %v40_v11  ;;  %v53_v15 = vmul.f32 %v48_v7, %v41_v12 }
  0x7c   :  { %36 = vst [vmem:[#allocation5 + $0x10] sm:$0xff] %v32_v8 }
  0x7d   :  { %60 = vrot.lane.b32.xlu2 %v51_v9, %s235_s15  ;;  %58 = vrot.lane.b32.xlu1 %v50_v10, %s235_s15 }
  0x83   :  { %v116_v13 = vpop.permute.xlu0 %115 }
  0x84   :  { %v118_v16 = vmul.f32 %v116_v13, %v38_v6  ;;  %v119_v17 = vmul.f32 %v116_v13, %v39_v5  ;;  %v121_v18 = vmul.f32 %v116_v13, %v41_v12  ;;  %v120_v19 = vmul.f32 %v116_v13, %v40_v11 }
  0x85   :  { %62 = vrot.lane.b32.xlu2 %v52_v14, %s235_s15  ;;  %64 = vrot.lane.b32.xlu1 %v53_v15, %s235_s15 }
  0x86   :  { %126 = vrot.lane.b32.xlu0 %v118_v16, %s240_s0 }
  0x8d   :  { %91 = vperm.xlu2 %180, %v28_v2   ;;  %128 = vrot.lane.b32.xlu1 %v119_v17, %s240_s0 }
  0x8e   :  { %132 = vrot.lane.b32.xlu0 %v121_v18, %s240_s0 }
  0x95   :  { %130 = vrot.lane.b32.xlu2 %v120_v19, %s240_s0 }
  0xd7   :  { %v61_v20 = vpop.permute.xlu2 %60 }
  0xdf   :  { %v63_v21 = vpop.permute.xlu2 %62 }
  0xe0   :  { %v75_v22 = vadd.f32 %v63_v21, %v32_v8 }
  0xe2   :  { %80 = vst.msk [vmem:[#allocation5 + $0x10] sm:$0xff] %vm77_vm0, %v75_v22 }
  0xe7   :  { %v92_v23 = vpop.permute.xlu2 %91 }
  0xe8   :  { %v95_v24 = vmul.f32 %v92_v23, %v39_v5  ;;  %v97_v30 = vmul.f32 %v92_v23, %v41_v12  ;;  %v94_v35 = vmul.f32 %v92_v23, %v38_v6  ;;  %v96_v37 = vmul.f32 %v92_v23, %v40_v11 }
  0xe9   :  { %v88_v39 = vld [vmem:[#allocation5 + $0x10] sm:$0xff] }
  0xea   :  { %v100_v42 = vadd.f32 %v96_v37, %v88_v39 }
  0xef   :  { %v59_v25 = vpop.permute.xlu1 %58  ;;  %v131_v43 = vpop.permute.xlu2 %130 }
  0xf0   :  { %v67_v26 = vsel %vm66_vm1, %v59_v25, %v61_v20  ;;  %v73_v27 = vadd.f32 %v59_v25, %v32_v8 }
  0xf1   :  { %v74_v28 = vadd.f32 %v67_v26, %v32_v8 }
  0xf2   :  { %78 = vst.msk [vmem:[#allocation5] sm:$0xff] %vm77_vm0, %v73_v27 }
  0xf3   :  { %v99_v29 = vadd.f32 %v95_v24, %v74_v28 }
  0xf5   :  { %103 = vst [vmem:[#allocation5 + $0x8] sm:$0xff] %v99_v29 }
  0xf7   :  { %v65_v31 = vpop.permute.xlu1 %64 }
  0xf8   :  { %v68_v32 = vsel %vm66_vm1, %v63_v21, %v65_v31  ;;  %v127_v33 = vpop.permute.xlu0 %126 }
  0xf9   :  { %v76_v34 = vadd.f32 %v68_v32, %v32_v8  ;;  %v86_v38 = vld [vmem:[#allocation5] sm:$0xff] }
  0xfa   :  { %v98_v40 = vadd.f32 %v94_v35, %v86_v38 }
  0xfb   :  { %v101_v36 = vadd.f32 %v97_v30, %v76_v34 }
  0xfd   :  { %105 = vst [vmem:[#allocation5 + $0x18] sm:$0xff] %v101_v36 }
  0xff   :  { %v129_v41 = vpop.permute.xlu1 %128 }
 0x100   :  { %v133_v44 = vpop.permute.xlu0 %132  ;;  %v135_v45 = vsel %vm134_vm2, %v127_v33, %v129_v41  ;;  %v142_v46 = vadd.f32 %v129_v41, %v99_v29 }
 0x101   :  { %v136_v47 = vsel %vm134_vm2, %v131_v43, %v133_v44  ;;  %v144_v48 = vadd.f32 %v133_v44, %v101_v36  ;;  %v141_v49 = vadd.f32 %v135_v45, %v98_v40 }
 0x102   :  { %v143_v50 = vadd.f32 %v136_v47, %v100_v42  ;;  %146 = vst.msk [vmem:[#allocation5 + $0x8] sm:$0xff] %vm134_vm2, %v142_v46 }
 0x103   :  { %148 = vst.msk [vmem:[#allocation5 + $0x18] sm:$0xff] %vm134_vm2, %v144_v48 }
 0x104   :  { %147 = vst [vmem:[#allocation5 + $0x10] sm:$0xff] %v143_v50 }
 0x105   :  { %145 = vst [vmem:[#allocation5] sm:$0xff] %v141_v49 }
 0x106   :  { %161 = dma.vmem_to_hbm [thread:$0]  %s154_s18, 512, %s156_s21, [#allocation4], %s234_s14, %s234_s14, %s235_s15  }
 0x107   :  { %231 = dma.done.wait [#allocation4], 512  }
 0x108   :  { %232 = vsyncadd [#allocation4], 4294966784 }
 0x109   :  { %166 = vsyncpa [#allocation3], 1 }
 0x10a   :  { %167 = vsyncpa [#allocation4], 1 }

</bundles_post_ra>
